<compile_context>
chip_gen: v7x
topology: tpu7x:2x2x1
jax: 0.10.0
libtpu: 0.0.40
codegen_flags: <defaults>
</compile_context>

<pallas_src>
import functools

import jax
import jax.numpy as jnp
from jax.experimental import pallas as pl
from jax.experimental.pallas import tpu as pltpu

EPS = 1e-5  # nn.LayerNorm default eps


def _round_up(x, m):
    return (x + m - 1) // m * m


# ---------------------------------------------------------------------------
# Exact-GELU helpers (Mosaic-safe: exp / div / mul / where only)
# ---------------------------------------------------------------------------
def _erf(z):
    # Abramowitz & Stegun 7.1.26, max abs error ~1.5e-7.
    az = jnp.abs(z)
    t = 1.0 / (1.0 + 0.3275911 * az)
    poly = t * (0.254829592 + t * (-0.284496736 + t * (1.421413741
               + t * (-1.453152027 + t * 1.061405429))))
    e = 1.0 - poly * jnp.exp(-az * az)
    return jnp.where(z < 0.0, -e, e)


def _gelu_exact(x):
    # nn.GELU() default is the exact erf GELU: 0.5 * x * (1 + erf(x / sqrt(2)))
    return 0.5 * x * (1.0 + _erf(x * 0.7071067811865476))


# ---------------------------------------------------------------------------
# Fused kernel: patch projection (matmul) + bias + LayerNorm + exact GELU
# ---------------------------------------------------------------------------
def _patch_embed_kernel(x_ref, w_ref, b_ref, g_ref, beta_ref, o_ref):
    # x: (TM, K) flattened patches, w: (K, E), b/g/beta: (1, E), o: (TM, E)
    y = jnp.dot(x_ref[...], w_ref[...], preferred_element_type=jnp.float32)
    y = y + b_ref[...].astype(jnp.float32)

    # LayerNorm over E (two cross-lane reductions, f32, two-pass for stability).
    mu = jnp.mean(y, axis=-1, keepdims=True)
    yc = y - mu
    var = jnp.mean(yc * yc, axis=-1, keepdims=True)
    yn = yc * jax.lax.rsqrt(var + EPS)
    yn = yn * g_ref[...].astype(jnp.float32) + beta_ref[...].astype(jnp.float32)

    o_ref[...] = _gelu_exact(yn).astype(o_ref.dtype)


# ---------------------------------------------------------------------------
# Tile selection: biggest MXU-friendly token tile that fits a VMEM budget
# ---------------------------------------------------------------------------
def _pick_tile(n_tok, K, E, *, tm=512, budget_bytes=24 << 20, dtype_bytes=4):
    tile = min(tm, _round_up(n_tok, 8))
    # per-step footprint ~ double-buffered (tile,K) + (tile,E) plus resident (K,E)
    while tile > 8 and (2 * dtype_bytes * tile * (K + E)
                        + dtype_bytes * K * E) > budget_bytes:
        tile //= 2
    return max(_round_up(tile, 8), 8)


# ---------------------------------------------------------------------------
# Forward wrapper
# ---------------------------------------------------------------------------
def patch_embed_forward(x_nchw, params, *, patch_size, tm=512):
    """x_nchw: (B, C, H, W) -> (B, embed_dim, H//p, W//p) (NCHW, like PyTorch)."""
    B, C, H, W = x_nchw.shape
    p = patch_size
    Hp, Wp = H // p, W // p
    E = params['w'].shape[0]
    K = C * p * p

    # im2col for the stride==kernel conv (layout glue only): each patch is
    # flattened in (c, ph, pw) order to match the Conv2d OIHW weight layout.
    patches = x_nchw.reshape(B, C, Hp, p, Wp, p)
    patches = patches.transpose(0, 2, 4, 1, 3, 5).reshape(B * Hp * Wp, K)

    w_mat = params['w'].reshape(E, K).T        # (K, E)
    b = params['b'].reshape(1, E)
    g = params['g'].reshape(1, E)
    beta = params['beta'].reshape(1, E)

    n_tok = B * Hp * Wp
    tile = _pick_tile(n_tok, K, E, tm=tm)
    n_pad = _round_up(n_tok, tile)
    if n_pad != n_tok:
        patches = jnp.pad(patches, ((0, n_pad - n_tok), (0, 0)))

    grid = (n_pad // tile,)
    out_tok = pl.pallas_call(
        _patch_embed_kernel,
        out_shape=jax.ShapeDtypeStruct((n_pad, E), x_nchw.dtype),
        grid_spec=pltpu.PrefetchScalarGridSpec(
            num_scalar_prefetch=0,
            grid=grid,
            in_specs=[
                pl.BlockSpec((tile, K), lambda i: (i, 0)),   # token tile (streamed)
                pl.BlockSpec((K, E), lambda i: (0, 0)),      # weight (resident)
                pl.BlockSpec((1, E), lambda i: (0, 0)),      # bias
                pl.BlockSpec((1, E), lambda i: (0, 0)),      # ln gamma
                pl.BlockSpec((1, E), lambda i: (0, 0)),      # ln beta
            ],
            out_specs=pl.BlockSpec((tile, E), lambda i: (i, 0)),
        ),
        compiler_params=pltpu.CompilerParams(
            dimension_semantics=("parallel",)),              # megacore on v7x
    )(patches, w_mat, b, g, beta)

    out = out_tok[:n_tok].reshape(B, Hp, Wp, E)
    return jnp.transpose(out, (0, 3, 1, 2))    # back to NCHW (PyTorch contract)


# ---------------------------------------------------------------------------
# Pure-JAX reference (same math, exact erf GELU) for the correctness check
# ---------------------------------------------------------------------------
def patch_embed_reference(x, params, patch_size):
    p = patch_size
    y = jax.lax.conv_general_dilated(
        x.astype(jnp.float32), params['w'].astype(jnp.float32),
        window_strides=(p, p), padding='VALID',
        dimension_numbers=('NCHW', 'OIHW', 'NCHW'),
        precision=jax.lax.Precision.HIGHEST)
    y = y + params['b'].reshape(1, -1, 1, 1)
    y = jnp.transpose(y, (0, 2, 3, 1))                       # NHWC
    mu = jnp.mean(y, -1, keepdims=True)
    var = jnp.mean((y - mu) ** 2, -1, keepdims=True)
    yn = (y - mu) / jnp.sqrt(var + EPS) * params['g'] + params['beta']
    yn = jax.nn.gelu(yn, approximate=False)
    return jnp.transpose(yn, (0, 3, 1, 2))                   # NCHW


if __name__ == "__main__":
    key = jax.random.PRNGKey(0)
    kx, kw, kb, kg, kbeta = jax.random.split(key, 5)

    # Small shapes consistent with PatchEmbed: batch=2, in_chans=3, 32x32 image,
    # patch_size=8 -> 4x4 = 16 patches/image, embed_dim=128 (lane-dense).
    B, C, H, W = 2, 3, 32, 32
    p, E = 8, 128

    x = jax.random.normal(kx, (B, C, H, W), jnp.float32)
    params = {
        'w': 0.02 * jax.random.normal(kw, (E, C, p, p), jnp.float32),
        'b': 0.02 * jax.random.normal(kb, (E,), jnp.float32),
        'g': 1.0 + 0.02 * jax.random.normal(kg, (E,), jnp.float32),
        'beta': 0.02 * jax.random.normal(kbeta, (E,), jnp.float32),
    }

    fwd = jax.jit(functools.partial(patch_embed_forward, patch_size=p))
    out = jax.block_until_ready(fwd(x, params))

    ref = patch_embed_reference(x, params, p)
    assert out.shape == (B, E, H // p, W // p), (out.shape,)
    max_err = float(jnp.max(jnp.abs(out - ref)))
    assert jnp.allclose(out, ref, atol=5e-3, rtol=5e-3), max_err

    print("KERNEL_OK")
</pallas_src>

<mosaic_0001>
module attributes {stable_mosaic.version = 11 : i64} {
  func.func @_patch_embed_kernel(%arg0: i32, %arg1: memref<32x192xf32, #tpu.memory_space<vmem>>, %arg2: memref<192x128xf32, #tpu.memory_space<vmem>>, %arg3: memref<1x128xf32, #tpu.memory_space<vmem>>, %arg4: memref<1x128xf32, #tpu.memory_space<vmem>>, %arg5: memref<1x128xf32, #tpu.memory_space<vmem>>, %arg6: memref<32x128xf32, #tpu.memory_space<vmem>>) attributes {dimension_semantics = [#tpu.dimension_semantics<parallel>], iteration_bounds = array<i64: 1>, scalar_prefetch = 0 : i64, scratch_operands = 0 : i64, tpu.core_type = #tpu.core_type<tc>, window_params = [{transform_indices = @transform_0, window_bounds = array<i64: 32, 192>}, {pipeline_mode = #tpu.pipeline_mode<synchronous>, transform_indices = @transform_1, window_bounds = array<i64: 192, 128>}, {pipeline_mode = #tpu.pipeline_mode<synchronous>, transform_indices = @transform_2, window_bounds = array<i64: 1, 128>}, {pipeline_mode = #tpu.pipeline_mode<synchronous>, transform_indices = @transform_3, window_bounds = array<i64: 1, 128>}, {pipeline_mode = #tpu.pipeline_mode<synchronous>, transform_indices = @transform_4, window_bounds = array<i64: 1, 128>}, {transform_indices = @transform_5, window_bounds = array<i64: 32, 128>}]} {
    %c0 = arith.constant 0 : index
    %c0_0 = arith.constant 0 : index
    %0 = vector.load %arg1[%c0, %c0_0] : memref<32x192xf32, #tpu.memory_space<vmem>>, vector<32x192xf32>
    %c0_1 = arith.constant 0 : index
    %c0_2 = arith.constant 0 : index
    %1 = vector.load %arg2[%c0_1, %c0_2] : memref<192x128xf32, #tpu.memory_space<vmem>>, vector<192x128xf32>
    %cst = arith.constant dense<0.000000e+00> : vector<32x128xf32>
    %2 = tpu.matmul %0, %1, %cst {dimension_numbers = #tpu.dot_dimension_numbers<[1], [0], [0], [1], [0, 0, 1, 1], [], []>} : vector<32x192xf32>, vector<192x128xf32>, vector<32x128xf32> -> vector<32x128xf32>
    %c0_3 = arith.constant 0 : index
    %c0_4 = arith.constant 0 : index
    %3 = vector.load %arg3[%c0_3, %c0_4] : memref<1x128xf32, #tpu.memory_space<vmem>>, vector<1x128xf32>
    %4 = vector.broadcast %3 : vector<1x128xf32> to vector<32x128xf32>
    %5 = arith.addf %2, %4 : vector<32x128xf32>
    %cst_5 = arith.constant dense<0.000000e+00> : vector<32xf32>
    %6 = vector.multi_reduction <add>, %5, %cst_5 [1] : vector<32x128xf32> to vector<32xf32>
    %7 = vector.shape_cast %6 : vector<32xf32> to vector<32x1xf32>
    %cst_6 = arith.constant 1.280000e+02 : f32
    %8 = vector.broadcast %cst_6 : f32 to vector<32x1xf32>
    %9 = arith.divf %7, %8 : vector<32x1xf32>
    %10 = vector.broadcast %9 : vector<32x1xf32> to vector<32x128xf32>
    %11 = arith.subf %5, %10 : vector<32x128xf32>
    %12 = arith.mulf %11, %11 : vector<32x128xf32>
    %cst_7 = arith.constant dense<0.000000e+00> : vector<32xf32>
    %13 = vector.multi_reduction <add>, %12, %cst_7 [1] : vector<32x128xf32> to vector<32xf32>
    %14 = vector.shape_cast %13 : vector<32xf32> to vector<32x1xf32>
    %cst_8 = arith.constant 1.280000e+02 : f32
    %15 = vector.broadcast %cst_8 : f32 to vector<32x1xf32>
    %16 = arith.divf %14, %15 : vector<32x1xf32>
    %cst_9 = arith.constant 9.99999974E-6 : f32
    %17 = vector.broadcast %cst_9 : f32 to vector<32x1xf32>
    %18 = arith.addf %16, %17 : vector<32x1xf32>
    %19 = math.rsqrt %18 : vector<32x1xf32>
    %20 = vector.broadcast %19 : vector<32x1xf32> to vector<32x128xf32>
    %21 = arith.mulf %11, %20 : vector<32x128xf32>
    %c0_10 = arith.constant 0 : index
    %c0_11 = arith.constant 0 : index
    %22 = vector.load %arg4[%c0_10, %c0_11] : memref<1x128xf32, #tpu.memory_space<vmem>>, vector<1x128xf32>
    %23 = vector.broadcast %22 : vector<1x128xf32> to vector<32x128xf32>
    %24 = arith.mulf %21, %23 : vector<32x128xf32>
    %c0_12 = arith.constant 0 : index
    %c0_13 = arith.constant 0 : index
    %25 = vector.load %arg5[%c0_12, %c0_13] : memref<1x128xf32, #tpu.memory_space<vmem>>, vector<1x128xf32>
    %26 = vector.broadcast %25 : vector<1x128xf32> to vector<32x128xf32>
    %27 = arith.addf %24, %26 : vector<32x128xf32>
    %cst_14 = arith.constant 5.000000e-01 : f32
    %28 = vector.broadcast %cst_14 : f32 to vector<32x128xf32>
    %29 = arith.mulf %28, %27 : vector<32x128xf32>
    %cst_15 = arith.constant 0.707106769 : f32
    %30 = vector.broadcast %cst_15 : f32 to vector<32x128xf32>
    %31 = arith.mulf %27, %30 : vector<32x128xf32>
    %32 = math.absf %31 : vector<32x128xf32>
    %cst_16 = arith.constant 0.327591091 : f32
    %33 = vector.broadcast %cst_16 : f32 to vector<32x128xf32>
    %34 = arith.mulf %33, %32 : vector<32x128xf32>
    %cst_17 = arith.constant 1.000000e+00 : f32
    %35 = vector.broadcast %cst_17 : f32 to vector<32x128xf32>
    %36 = arith.addf %35, %34 : vector<32x128xf32>
    %cst_18 = arith.constant 1.000000e+00 : f32
    %37 = vector.broadcast %cst_18 : f32 to vector<32x128xf32>
    %38 = arith.divf %37, %36 : vector<32x128xf32>
    %cst_19 = arith.constant 1.06140542 : f32
    %39 = vector.broadcast %cst_19 : f32 to vector<32x128xf32>
    %40 = arith.mulf %38, %39 : vector<32x128xf32>
    %cst_20 = arith.constant -1.45315206 : f32
    %41 = vector.broadcast %cst_20 : f32 to vector<32x128xf32>
    %42 = arith.addf %41, %40 : vector<32x128xf32>
    %43 = arith.mulf %38, %42 : vector<32x128xf32>
    %cst_21 = arith.constant 1.42141378 : f32
    %44 = vector.broadcast %cst_21 : f32 to vector<32x128xf32>
    %45 = arith.addf %44, %43 : vector<32x128xf32>
    %46 = arith.mulf %38, %45 : vector<32x128xf32>
    %cst_22 = arith.constant -0.284496725 : f32
    %47 = vector.broadcast %cst_22 : f32 to vector<32x128xf32>
    %48 = arith.addf %47, %46 : vector<32x128xf32>
    %49 = arith.mulf %38, %48 : vector<32x128xf32>
    %cst_23 = arith.constant 0.254829586 : f32
    %50 = vector.broadcast %cst_23 : f32 to vector<32x128xf32>
    %51 = arith.addf %50, %49 : vector<32x128xf32>
    %52 = arith.mulf %38, %51 : vector<32x128xf32>
    %cst_24 = arith.constant 0.000000e+00 : f32
    %53 = vector.broadcast %cst_24 : f32 to vector<32x128xf32>
    %54 = arith.subf %53, %32 : vector<32x128xf32>
    %55 = arith.mulf %54, %32 : vector<32x128xf32>
    %56 = math.exp %55 : vector<32x128xf32>
    %57 = arith.mulf %52, %56 : vector<32x128xf32>
    %cst_25 = arith.constant 1.000000e+00 : f32
    %58 = vector.broadcast %cst_25 : f32 to vector<32x128xf32>
    %59 = arith.subf %58, %57 : vector<32x128xf32>
    %cst_26 = arith.constant 0.000000e+00 : f32
    %60 = vector.broadcast %cst_26 : f32 to vector<32x128xf32>
    %61 = arith.cmpf olt, %31, %60 : vector<32x128xf32>
    %cst_27 = arith.constant 0.000000e+00 : f32
    %62 = vector.broadcast %cst_27 : f32 to vector<32x128xf32>
    %63 = arith.subf %62, %59 : vector<32x128xf32>
    %64 = arith.select %61, %63, %59 : vector<32x128xi1>, vector<32x128xf32>
    %cst_28 = arith.constant 1.000000e+00 : f32
    %65 = vector.broadcast %cst_28 : f32 to vector<32x128xf32>
    %66 = arith.addf %65, %64 : vector<32x128xf32>
    %67 = arith.mulf %29, %66 : vector<32x128xf32>
    %c0_29 = arith.constant 0 : index
    %c0_30 = arith.constant 0 : index
    %68 = vector.load %arg6[%c0_29, %c0_30] : memref<32x128xf32, #tpu.memory_space<vmem>>, vector<32x128xf32>
    tpu.vector_store %arg6[%c0_29, %c0_30], %67 {strides = array<i32>} : memref<32x128xf32, #tpu.memory_space<vmem>>, vector<32x128xf32>,
    return
  }
  func.func @transform_0(%arg0: i32) -> (i32, i32) {
    %c0_i32 = arith.constant 0 : i32
    %c0_i32_0 = arith.constant 0 : i32
    return %arg0, %c0_i32 : i32, i32
  }
  func.func @transform_1(%arg0: i32) -> (i32, i32) {
    %c0_i32 = arith.constant 0 : i32
    %c0_i32_0 = arith.constant 0 : i32
    %c0_i32_1 = arith.constant 0 : i32
    return %c0_i32, %c0_i32_0 : i32, i32
  }
  func.func @transform_2(%arg0: i32) -> (i32, i32) {
    %c0_i32 = arith.constant 0 : i32
    %c0_i32_0 = arith.constant 0 : i32
    %c0_i32_1 = arith.constant 0 : i32
    return %c0_i32, %c0_i32_0 : i32, i32
  }
  func.func @transform_3(%arg0: i32) -> (i32, i32) {
    %c0_i32 = arith.constant 0 : i32
    %c0_i32_0 = arith.constant 0 : i32
    %c0_i32_1 = arith.constant 0 : i32
    return %c0_i32, %c0_i32_0 : i32, i32
  }
  func.func @transform_4(%arg0: i32) -> (i32, i32) {
    %c0_i32 = arith.constant 0 : i32
    %c0_i32_0 = arith.constant 0 : i32
    %c0_i32_1 = arith.constant 0 : i32
    return %c0_i32, %c0_i32_0 : i32, i32
  }
  func.func @transform_5(%arg0: i32) -> (i32, i32) {
    %c0_i32 = arith.constant 0 : i32
    %c0_i32_0 = arith.constant 0 : i32
    return %arg0, %c0_i32 : i32, i32
  }
}

</mosaic_0001>

<bundles_post_ra>
// kernel: patch_embed_forward.1
= control target key start
LH: loop header
LB: loop body
LE: loop exit
PB: predicated region body
PF: predicated region fallthrough
CT: control target
= control target key end

     0   :  { %v472_v3 = vmov 0.0|0.0   ;;  %vm60_vm0 = vcmask 523264   ;;  %s683_s0 = inlined_call_operand.vmem [shape: f32[32,192], index: 0, kind: input, shape index: {}]   ;;  %s684_s1 = inlined_call_operand.vmem [shape: f32[192,128], index: 1, kind: input, shape index: {}]   ;;  %s685_s2 = inlined_call_operand.vmem [shape: f32[1,128], index: 2, kind: input, shape index: {}]   ;;  %s686_s3 = inlined_call_operand.vmem [shape: f32[1,128], index: 3, kind: input, shape index: {}]   ;;  %s687_s4 = inlined_call_operand.vmem [shape: f32[1,128], index: 4, kind: input, shape index: {}]   ;;  %s688_s5 = inlined_call_operand.hbm [shape: f32[32,128], index: 5, kind: output, shape index: {}]  }
   0x1   :  { %v29_v0 = vld [vmem:[%s684_s1] sm:$0xff]  ;;  %v30_v1 = vld [vmem:[%s684_s1 + $0x8] sm:$0xff]  ;;  %v31_v2 = vld [vmem:[%s684_s1 + $0x10] sm:$0xff]  ;;  %360 = vmatprep.subr.bf16.mxu0 %v472_v3  ;;  %396 = vmatprep.subr.bf16.mxu1 %v472_v3 }
   0x2   :  { %v361_v4 = vpack.c.bf16 %v30_v1, %v29_v0  ;;  %v32_v5 = vld [vmem:[%s684_s1 + $0x18] sm:$0xff]  ;;  %v33_v7 = vld [vmem:[%s684_s1 + $0x20] sm:$0xff]  ;;  %v34_v8 = vld [vmem:[%s684_s1 + $0x28] sm:$0xff] }
   0x3   :  { %v364_v6 = vpack.c.bf16 %v32_v5, %v31_v2  ;;  %v367_v9 = vpack.c.bf16 %v34_v8, %v33_v7  ;;  %v35_v10 = vld [vmem:[%s684_s1 + $0x30] sm:$0xff]  ;;  %v36_v11 = vld [vmem:[%s684_s1 + $0x38] sm:$0xff]  ;;  %v22_v12 = vld [vmem:[%s683_s0 + $0x8] sm:$0xff] }
   0x4   :  { %362 = vmatpush1.bf16.msra.mxu0 %v361_v4  ;;  %408 = vmatpush1.bf16.msra.mxu1 %v361_v4  ;;  %v26_v13 = vld [vmem:[%s683_s0 + $0x28] sm:$0xff]  ;;  %v370_v14 = vpack.c.bf16 %v36_v11, %v35_v10 }
   0x5   :  { %363 = vmatprep.subr.bf16.mxu0 %v472_v3  ;;  %397 = vmatprep.subr.bf16.mxu1 %v472_v3 }
   0x6   :  { %354 = vmatprep.mubr.msk.f32.mxu0 %vm60_vm0, %v22_v12  ;;  %356 = vmatprep.mubr.msk.f32.mxu1 %vm60_vm0, %v26_v13 }
   0x8   :  { %365 = vmatpush1.bf16.msra.mxu0 %v364_v6  ;;  %409 = vmatpush1.bf16.msra.mxu1 %v364_v6 }
   0x9   :  { %366 = vmatprep.subr.bf16.mxu0 %v472_v3  ;;  %398 = vmatprep.subr.bf16.mxu1 %v472_v3 }
   0xc   :  { %368 = vmatpush1.bf16.msra.mxu0 %v367_v9  ;;  %410 = vmatpush1.bf16.msra.mxu1 %v367_v9 }
   0xd   :  { %10 = vsyncpa [#allocation3], 0  ;;  %369 = vmatprep.subr.bf16.mxu0 %v472_v3  ;;  %399 = vmatprep.subr.bf16.mxu1 %v472_v3  ;;  %v37_v15 = vld [vmem:[%s684_s1 + $0x40] sm:$0xff]  ;;  %v38_v16 = vld [vmem:[%s684_s1 + $0x48] sm:$0xff] }
   0xe   :  { %v373_v17 = vpack.c.bf16 %v38_v16, %v37_v15  ;;  %v39_v18 = vld [vmem:[%s684_s1 + $0x50] sm:$0xff]  ;;  %v40_v19 = vld [vmem:[%s684_s1 + $0x58] sm:$0xff]  ;;  %v41_v21 = vld [vmem:[%s684_s1 + $0x60] sm:$0xff] }
   0xf   :  { %v376_v20 = vpack.c.bf16 %v40_v19, %v39_v18  ;;  %v42_v22 = vld [vmem:[%s684_s1 + $0x68] sm:$0xff]  ;;  %v43_v24 = vld [vmem:[%s684_s1 + $0x70] sm:$0xff]  ;;  %v44_v25 = vld [vmem:[%s684_s1 + $0x78] sm:$0xff] }
  0x10   :  { %371 = vmatpush1.bf16.msra.mxu0 %v370_v14  ;;  %411 = vmatpush1.bf16.msra.mxu1 %v370_v14  ;;  %v379_v23 = vpack.c.bf16 %v42_v22, %v41_v21  ;;  %v382_v26 = vpack.c.bf16 %v44_v25, %v43_v24  ;;  %v45_v27 = vld [vmem:[%s684_s1 + $0x80] sm:$0xff]  ;;  %v46_v28 = vld [vmem:[%s684_s1 + $0x88] sm:$0xff]  ;;  %v47_v30 = vld [vmem:[%s684_s1 + $0x90] sm:$0xff] }
  0x11   :  { %372 = vmatprep.subr.bf16.mxu0 %v472_v3  ;;  %400 = vmatprep.subr.bf16.mxu1 %v472_v3  ;;  %v385_v29 = vpack.c.bf16 %v46_v28, %v45_v27  ;;  %v48_v31 = vld [vmem:[%s684_s1 + $0x98] sm:$0xff]  ;;  %v49_v33 = vld [vmem:[%s684_s1 + $0xa0] sm:$0xff]  ;;  %v50_v34 = vld [vmem:[%s684_s1 + $0xa8] sm:$0xff] }
  0x12   :  { %v388_v32 = vpack.c.bf16 %v48_v31, %v47_v30  ;;  %v391_v35 = vpack.c.bf16 %v50_v34, %v49_v33  ;;  %v51_v36 = vld [vmem:[%s684_s1 + $0xb0] sm:$0xff]  ;;  %v52_v37 = vld [vmem:[%s684_s1 + $0xb8] sm:$0xff]  ;;  %v21_v39 = vld [vmem:[%s683_s0] sm:$0xff] }
  0x13   :  { %v394_v38 = vpack.c.bf16 %v52_v37, %v51_v36  ;;  %v25_v40 = vld [vmem:[%s683_s0 + $0x20] sm:$0xff]  ;;  %v24_v41 = vld [vmem:[%s683_s0 + $0x18] sm:$0xff]  ;;  %v23_v43 = vld [vmem:[%s683_s0 + $0x10] sm:$0xff] }
  0x14   :  { %374 = vmatpush1.bf16.msra.mxu0 %v373_v17  ;;  %412 = vmatpush1.bf16.msra.mxu1 %v373_v17  ;;  %v28_v42 = vld [vmem:[%s683_s0 + $0x38] sm:$0xff]  ;;  %v27_v44 = vld [vmem:[%s683_s0 + $0x30] sm:$0xff]  ;;  %v353_v45 = vld [vmem:[%s685_s2] ss:$0 sm:$0xff] }
  0x15   :  { %375 = vmatprep.subr.bf16.mxu0 %v472_v3  ;;  %401 = vmatprep.subr.bf16.mxu1 %v472_v3  ;;  %v359_v25 = vld [vmem:[%s687_s4] ss:$0 sm:$0xff] }
  0x18   :  { %377 = vmatpush1.bf16.msra.mxu0 %v376_v20  ;;  %413 = vmatpush1.bf16.msra.mxu1 %v376_v20 }
  0x19   :  { %378 = vmatprep.subr.bf16.mxu0 %v472_v3  ;;  %402 = vmatprep.subr.bf16.mxu1 %v472_v3 }
  0x1c   :  { %380 = vmatpush1.bf16.msra.mxu0 %v379_v23  ;;  %414 = vmatpush1.bf16.msra.mxu1 %v379_v23  ;;  %v358_v23 = vld [vmem:[%s686_s3] ss:$0 sm:$0xff]  ;;  %s473_s3 = smov [#allocation2]  }
  0x1d   :  { %381 = vmatprep.subr.bf16.mxu0 %v472_v3  ;;  %403 = vmatprep.subr.bf16.mxu1 %v472_v3  ;;  %s342_s4 = sshll.u32 %s473_s3, 4  ;;  %s343_s4 = int_to_ptr.vmem [resolvable:$true] %s342_s4 }
  0x1e   :  { %s448_s10 = scalar_lea.vmem %s343_s4, 512  ;;  %p453_p1 = scmp.lt.s32.totalorder %s343_s4, %s343_s4 }
  0x1f   :  { %p449_p0 = scmp.ne.s32.totalorder %s343_s4, %s448_s10  ;;  %p454_p2 = scmp.lt.s32.totalorder %s448_s10, %s448_s10 }
  0x20   :  { %383 = vmatpush1.bf16.msra.mxu0 %v382_v26  ;;  %415 = vmatpush1.bf16.msra.mxu1 %v382_v26 }
  0x21   :  { %384 = vmatprep.subr.bf16.mxu0 %v472_v3  ;;  %404 = vmatprep.subr.bf16.mxu1 %v472_v3  ;;  %p455_p3 = por %p454_p2, %p453_p1 }
  0x23   :  { %p456_p4 = pnand %p455_p3, %p449_p0 }
  0x24   :  { %386 = vmatpush1.bf16.msra.mxu0 %v385_v29  ;;  %416 = vmatpush1.bf16.msra.mxu1 %v385_v29 }
  0x25   :  { %387 = vmatprep.subr.bf16.mxu0 %v472_v3  ;;  %405 = vmatprep.subr.bf16.mxu1 %v472_v3 }
  0x28   :  { %389 = vmatpush1.bf16.msra.mxu0 %v388_v32  ;;  %417 = vmatpush1.bf16.msra.mxu1 %v388_v32 }
  0x29   :  { %390 = vmatprep.subr.bf16.mxu0 %v472_v3  ;;  %406 = vmatprep.subr.bf16.mxu1 %v472_v3 }
  0x2c   :  { %392 = vmatpush1.bf16.msra.mxu0 %v391_v35  ;;  %418 = vmatpush1.bf16.msra.mxu1 %v391_v35 }
  0x2d   :  { %393 = vmatprep.subr.bf16.mxu0 %v472_v3  ;;  %407 = vmatprep.subr.bf16.mxu1 %v472_v3 }
  0x30   :  { %395 = vmatpush1.bf16.msra.mxu0 %v394_v38  ;;  %419 = vmatpush1.bf16.msra.mxu1 %v394_v38 }
  0x33   :  { %138 = vmatmul.mubr.f32.vlgmr.msra.gmra.mrb[0].mxu0 %v21_v39  ;;  %148 = vmatmul.mubr.f32.vlgmr.msra.gmra.mrb[0].mxu1 %v25_v40 }
  0x34   :  { %355 = vmatprep.mubr.msk.f32.mxu0 %vm60_vm0, %v24_v41  ;;  %357 = vmatprep.mubr.msk.f32.mxu1 %vm60_vm0, %v28_v42 }
  0x37   :  { %143 = vmatmul.mubr.f32.gmra.mrb[2].mxu0 %v23_v43  ;;  %153 = vmatmul.mubr.f32.gmra.mrb[2].mxu1 %v27_v44 }
 0x106   :  { %v139_v46 = vpop.f32.mrb[0].mxu0  ;;  %v149_v47 = vpop.f32.mrb[0].mxu1 }
 0x107   :  { %v140_v48 = vadd.f32 %v353_v45, %v139_v46  ;;  %v150_v49 = vadd.f32 %v353_v45, %v149_v47  ;;  %v141_v50 = vpop.f32.mrb[1].mxu0  ;;  %v151_v51 = vpop.f32.mrb[1].mxu1 }
 0x109   :  { %162 = vadd.xlane.f32.xlu1 %v150_v49  ;;  %158 = vadd.xlane.f32.xlu0 %v140_v48 }
 0x10a   :  { %v144_v52 = vpop.f32.mrb[2].mxu0  ;;  %v154_v53 = vpop.f32.mrb[2].mxu1 }
 0x10b   :  { %v145_v54 = vadd.f32 %v353_v45, %v144_v52  ;;  %v155_v55 = vadd.f32 %v353_v45, %v154_v53  ;;  %v146_v56 = vpop.f32.mrb[3].mxu0  ;;  %v156_v57 = vpop.f32.mrb[3].mxu1 }
 0x10d   :  { %164 = vadd.xlane.f32.xlu1 %v155_v55  ;;  %160 = vadd.xlane.f32.xlu0 %v145_v54 }
 0x196   :  { %v163_v58 = vpop.xlane.xlu1 %162  ;;  %v159_v59 = vpop.xlane.xlu0 %158 }
 0x197   :  { %v169_v60 = vmul.f32 0.0078125, %v163_v58  ;;  %v167_v61 = vmul.f32 0.0078125, %v159_v59 }
 0x199   :  { %v171_v62 = vsub.f32 %v140_v48, %v167_v61  ;;  %v173_v1 = vsub.f32 %v150_v49, %v169_v60 }
 0x19a   :  { %v165_v63 = vpop.xlane.xlu1 %164  ;;  %v161_v0 = vpop.xlane.xlu0 %160 }
 0x19b   :  { %v170_v2 = vmul.f32 0.0078125, %v165_v63  ;;  %v168_v3 = vmul.f32 0.0078125, %v161_v0  ;;  %v175_v4 = vmul.f32 %v171_v62, %v171_v62  ;;  %v177_v7 = vmul.f32 %v173_v1, %v173_v1 }
 0x19d   :  { %v172_v5 = vsub.f32 %v145_v54, %v168_v3  ;;  %179 = vadd.xlane.f32.xlu0 %v175_v4  ;;  %v174_v6 = vsub.f32 %v155_v55, %v170_v2 }
 0x19f   :  { %v176_v8 = vmul.f32 %v172_v5, %v172_v5  ;;  %v178_v9 = vmul.f32 %v174_v6, %v174_v6 }
 0x1a1   :  { %183 = vadd.xlane.f32.xlu0 %v177_v7  ;;  %181 = vadd.xlane.f32.xlu1 %v176_v8 }
 0x1a5   :  { %185 = vadd.xlane.f32.xlu1 %v178_v9 }
 0x22a   :  { %v180_v10 = vpop.xlane.xlu0 %179 }
 0x22b   :  { %v187_v11 = vmul.f32 0.0078125, %v180_v10 }
 0x22d   :  { %v191_v12 = vadd.f32 1e-05, %v187_v11 }
 0x22e   :  { %v182_v13 = vpop.xlane.xlu1 %181  ;;  %v184_v14 = vpop.xlane.xlu0 %183 }
 0x22f   :  { %424 = vrsqrt.f32 %v191_v12  ;;  %v188_v15 = vmul.f32 0.0078125, %v182_v13  ;;  %v189_v16 = vmul.f32 0.0078125, %v184_v14 }
 0x231   :  { %v192_v17 = vadd.f32 1e-05, %v188_v15  ;;  %v193_v18 = vadd.f32 1e-05, %v189_v16 }
 0x232   :  { %v186_v19 = vpop.xlane.xlu1 %185 }
 0x233   :  { %426 = vrsqrt.f32 %v192_v17  ;;  %v190_v20 = vmul.f32 0.0078125, %v186_v19 }
 0x234   :  { %428 = vrsqrt.f32 %v193_v18 }
 0x235   :  { %v194_v21 = vadd.f32 1e-05, %v190_v20 }
 0x237   :  { %430 = vrsqrt.f32 %v194_v21 }
 0x239   :  { %v425_v22 = vpop.eup %424 }
 0x23a   :  { %v199_v24 = vmul.f32 %v425_v22, %v171_v62 }
 0x23c   :  { %v210_v26 = vmul.f32 %v358_v23, %v199_v24 }
 0x23d   :  { %v427_v27 = vpop.eup %426 }
 0x23e   :  { %v429_v28 = vpop.eup %428  ;;  %v639_v29 = vadd.f32 %v359_v25, %v210_v26  ;;  %v200_v30 = vmul.f32 %v427_v27, %v172_v5 }
 0x23f   :  { %v201_v31 = vmul.f32 %v429_v28, %v173_v1 }
 0x240   :  { %v642_v32 = vmul.f32 0.70710677, %v639_v29  ;;  %v211_v33 = vmul.f32 %v358_v23, %v200_v30 }
 0x241   :  { %v431_v34 = vpop.eup %430  ;;  %v212_v35 = vmul.f32 %v358_v23, %v201_v31 }
 0x242   :  { %v233_v36 = vand.u32 2147483647, %v642_v32  ;;  %v645_v37 = vadd.f32 %v359_v25, %v211_v33  ;;  %v202_v38 = vmul.f32 %v431_v34, %v174_v6  ;;  %vm313_vm1 = vcmp.lt.f32.partialorder %v642_v32, 0.0 }
 0x243   :  { %v647_v39 = vadd.f32 %v359_v25, %v212_v35 }
 0x244   :  { %v237_v40 = vmul.f32 0.3275911, %v233_v36  ;;  %v650_v41 = vmul.f32 0.70710677, %v645_v37  ;;  %v213_v42 = vmul.f32 %v358_v23, %v202_v38  ;;  %v289_v55 = vsub.f32 0.0, %v233_v36 }
 0x245   :  { %v653_v43 = vmul.f32 0.70710677, %v647_v39 }
 0x246   :  { %v241_v44 = vadd.f32 1.0, %v237_v40  ;;  %v234_v45 = vand.u32 2147483647, %v650_v41  ;;  %v656_v46 = vadd.f32 %v359_v25, %v213_v42  ;;  %v293_v58 = vmul.f32 %v289_v55, %v233_v36 }
 0x247   :  { %v235_v47 = vand.u32 2147483647, %v653_v43  ;;  %vm314_vm2 = vcmp.lt.f32.partialorder %v650_v41, 0.0  ;;  %vm315_vm3 = vcmp.lt.f32.partialorder %v653_v43, 0.0 }
 0x248   :  { %432 = vrcp.f32 %v241_v44  ;;  %v238_v48 = vmul.f32 0.3275911, %v234_v45  ;;  %v660_v50 = vmul.f32 0.70710677, %v656_v46  ;;  %v290_v59 = vsub.f32 0.0, %v234_v45 }
 0x249   :  { %v239_v49 = vmul.f32 0.3275911, %v235_v47  ;;  %v291_v60 = vsub.f32 0.0, %v235_v47  ;;  %v297_v0 = vmul.f32 1.442695, %v293_v58  ;;  %v228_v43 = vmul.f32 0.5, %v656_v46 }
 0x24a   :  { %v242_v51 = vadd.f32 1.0, %v238_v48  ;;  %v236_v53 = vand.u32 2147483647, %v660_v50  ;;  %v294_v1 = vmul.f32 %v290_v59, %v234_v45  ;;  %vm316_vm4 = vcmp.lt.f32.partialorder %v660_v50, 0.0 }
 0x24b   :  { %v243_v52 = vadd.f32 1.0, %v239_v49  ;;  %v295_v3 = vmul.f32 %v291_v60, %v235_v47 }
 0x24c   :  { %434 = vrcp.f32 %v242_v51  ;;  %v240_v54 = vmul.f32 0.3275911, %v236_v53  ;;  %v292_v4 = vsub.f32 0.0, %v236_v53  ;;  %v299_v10 = vmul.f32 1.442695, %v294_v1 }
 0x24d   :  { %436 = vrcp.f32 %v243_v52  ;;  %v301_v13 = vmul.f32 1.442695, %v295_v3 }
 0x24e   :  { %v244_v56 = vadd.f32 1.0, %v240_v54  ;;  %v296_v14 = vmul.f32 %v292_v4, %v236_v53 }
 0x250   :  { %438 = vrcp.f32 %v244_v56  ;;  %v303_v23 = vmul.f32 1.442695, %v296_v14 }
 0x251   :  { %440 = vpow2.f32 %v297_v0 }
 0x252   :  { %v433_v57 = vpop.eup %432  ;;  %442 = vpow2.f32 %v299_v10 }
 0x253   :  { %v253_v61 = vmul.f32 1.0614054, %v433_v57  ;;  %444 = vpow2.f32 %v301_v13 }
 0x254   :  { %446 = vpow2.f32 %v303_v23 }
 0x255   :  { %v257_v62 = vadd.f32 -1.4531521, %v253_v61  ;;  %v225_v61 = vmul.f32 0.5, %v639_v29  ;;  %v227_v29 = vmul.f32 0.5, %v647_v39 }
 0x256   :  { %v435_v63 = vpop.eup %434 }
 0x257   :  { %v437_v2 = vpop.eup %436  ;;  %v254_v5 = vmul.f32 1.0614054, %v435_v63  ;;  %v261_v6 = vmul.f32 %v433_v57, %v257_v62 }
 0x258   :  { %v255_v7 = vmul.f32 1.0614054, %v437_v2 }
 0x259   :  { %v258_v8 = vadd.f32 -1.4531521, %v254_v5  ;;  %v265_v9 = vadd.f32 1.4214138, %v261_v6 }
 0x25a   :  { %v259_v11 = vadd.f32 -1.4531521, %v255_v7  ;;  %v439_v12 = vpop.eup %438  ;;  %v226_v7 = vmul.f32 0.5, %v645_v37 }
 0x25b   :  { %v262_v15 = vmul.f32 %v435_v63, %v258_v8  ;;  %v269_v16 = vmul.f32 %v433_v57, %v265_v9  ;;  %v256_v17 = vmul.f32 1.0614054, %v439_v12  ;;  %v441_v36 = vpop.eup %440 }
 0x25c   :  { %v263_v18 = vmul.f32 %v437_v2, %v259_v11  ;;  %v443_v51 = vpop.eup %442 }
 0x25d   :  { %v266_v19 = vadd.f32 1.4214138, %v262_v15  ;;  %v273_v20 = vadd.f32 -0.28449672, %v269_v16  ;;  %v260_v21 = vadd.f32 -1.4531521, %v256_v17  ;;  %v445_v54 = vpop.eup %444 }
 0x25e   :  { %v267_v22 = vadd.f32 1.4214138, %v263_v18  ;;  %v447_v3 = vpop.eup %446 }
 0x25f   :  { %v270_v24 = vmul.f32 %v435_v63, %v266_v19  ;;  %v277_v25 = vmul.f32 %v433_v57, %v273_v20  ;;  %v264_v26 = vmul.f32 %v439_v12, %v260_v21 }
 0x260   :  { %v271_v27 = vmul.f32 %v437_v2, %v267_v22 }
 0x261   :  { %v274_v28 = vadd.f32 -0.28449672, %v270_v24  ;;  %v281_v30 = vadd.f32 0.2548296, %v277_v25  ;;  %v268_v31 = vadd.f32 1.4214138, %v264_v26 }
 0x262   :  { %v275_v33 = vadd.f32 -0.28449672, %v271_v27 }
 0x263   :  { %v278_v34 = vmul.f32 %v435_v63, %v274_v28  ;;  %v285_v35 = vmul.f32 %v433_v57, %v281_v30  ;;  %v272_v38 = vmul.f32 %v439_v12, %v268_v31 }
 0x264   :  { %v279_v40 = vmul.f32 %v437_v2, %v275_v33 }
 0x265   :  { %v282_v42 = vadd.f32 0.2548296, %v278_v34  ;;  %v305_v44 = vmul.f32 %v441_v36, %v285_v35  ;;  %v276_v45 = vadd.f32 -0.28449672, %v272_v38 }
 0x266   :  { %v283_v47 = vadd.f32 0.2548296, %v279_v40 }
 0x267   :  { %v286_v48 = vmul.f32 %v435_v63, %v282_v42  ;;  %v309_v49 = vsub.f32 1.0, %v305_v44  ;;  %v280_v52 = vmul.f32 %v439_v12, %v276_v45 }
 0x268   :  { %v287_v53 = vmul.f32 %v437_v2, %v283_v47 }
 0x269   :  { %v306_v55 = vmul.f32 %v443_v51, %v286_v48  ;;  %v317_v56 = vsub.f32 0.0, %v309_v49  ;;  %v284_v58 = vadd.f32 0.2548296, %v280_v52 }
 0x26a   :  { %v307_v59 = vmul.f32 %v445_v54, %v287_v53 }
 0x26b   :  { %v310_v57 = vsub.f32 1.0, %v306_v55  ;;  %v321_v60 = vsel %vm313_vm1, %v317_v56, %v309_v49  ;;  %v288_v62 = vmul.f32 %v439_v12, %v284_v58 }
 0x26c   :  { %v311_v0 = vsub.f32 1.0, %v307_v59  ;;  %v325_v1 = vadd.f32 1.0, %v321_v60 }
 0x26d   :  { %v318_v63 = vsub.f32 0.0, %v310_v57  ;;  %v308_v4 = vmul.f32 %v447_v3, %v288_v62 }
 0x26e   :  { %v319_v2 = vsub.f32 0.0, %v311_v0  ;;  %v329_v5 = vmul.f32 %v325_v1, %v225_v61 }
 0x26f   :  { %v322_v6 = vsel %vm314_vm2, %v318_v63, %v310_v57  ;;  %v312_v32 = vsub.f32 1.0, %v308_v4 }
 0x270   :  { %v323_v8 = vsel %vm315_vm3, %v319_v2, %v311_v0  ;;  %v326_v9 = vadd.f32 1.0, %v322_v6  ;;  %333 = vst [vmem:[#allocation2] sm:$0xff] %v329_v5 }
 0x271   :  { %v327_v10 = vadd.f32 1.0, %v323_v8  ;;  %v320_v11 = vsub.f32 0.0, %v312_v32 }
 0x272   :  { %v330_v12 = vmul.f32 %v326_v9, %v226_v7 }
 0x273   :  { %v331_v13 = vmul.f32 %v327_v10, %v227_v29  ;;  %v324_v41 = vsel %vm316_vm4, %v320_v11, %v312_v32 }
 0x274   :  { %334 = vst [vmem:[#allocation2 + $0x8] sm:$0xff] %v330_v12  ;;  %v328_v14 = vadd.f32 1.0, %v324_v41 }
 0x275   :  { %335 = vst [vmem:[#allocation2 + $0x10] sm:$0xff] %v331_v13 }
 0x276   :  { %v332_v37 = vmul.f32 %v328_v14, %v228_v43 }
 0x278   :  { %336 = vst [vmem:[#allocation2 + $0x18] sm:$0xff] %v332_v37 }
 0x279   :  { %459 = shalt.err (!%p456_p4)
}
 0x27a   :  { %s460_s13 = scalar_lea.hbm %s688_s5, 512 }
 0x27b   :  { %p461_p5 = scmp.ne.s32.totalorder %s688_s5, %s460_s13  ;;  %p464_p6 = scmp.lt.u32.totalorder %s460_s13, %s688_s5 }
 0x27d   :  { %p466_p7 = pnand %p464_p6, %p461_p5 }
 0x27f   :  { %469 = shalt.err (!%p466_p7)
}
 0x280   :  { %s474_s18 = smov 128   ;;  %s475_s19 = smov 8  }
 0x281   :  { %348 = dma.vmem_to_hbm [thread:$0]  %s343_s4, 512, %s688_s5, [#allocation3], %s474_s18, %s474_s18, %s475_s19  }
 0x282   :  { %470 = dma.done.wait [#allocation3], 512  }
 0x283   :  { %471 = vsyncadd [#allocation3], 4294966784 }
 0x284   :  { %352 = vsyncpa [#allocation3], 1 }

</bundles_post_ra>
